<compile_context>
chip_gen: v5e
topology: v5e:2x2
jax: 0.10.0
libtpu: 0.0.40
codegen_flags: <defaults>
</compile_context>

<pallas_src>
import jax
import jax.numpy as jnp
from jax.experimental import pallas as pl
from jax.experimental.pallas import tpu as pltpu


def _round_up(n, m):
    return ((n + m - 1) // m) * m


def _discriminator_kernel(x_ref, w1_ref, b1_ref, w2_ref, b2_ref, w3_ref, b3_ref, o_ref):
    # Layer 1: (TB, D) @ (D, H) -> (TB, H); bf16 MXU inputs, f32 accumulation.
    h = jnp.dot(x_ref[...], w1_ref[...], preferred_element_type=jnp.float32)
    h = h + b1_ref[...]                       # (1, H) broadcasts over batch rows
    h = jnp.maximum(h, 0.2 * h)               # LeakyReLU(0.2): mul + vmax

    # Layer 2: (TB, H) @ (H, H)
    h = jnp.dot(h.astype(jnp.bfloat16), w2_ref[...], preferred_element_type=jnp.float32)
    h = h + b2_ref[...]
    h = jnp.maximum(h, 0.2 * h)

    # Layer 3: output_dim == 1, so do it on the VPU (mul) + XLU (lane reduce)
    # instead of pushing a 1-wide (or zero-padded) N dim through the MXU.
    # w3_ref is a (1, H) f32 row; result stays 1 lane wide -> tiny epilogue.
    logit = jnp.sum(h * w3_ref[...], axis=-1, keepdims=True) + b3_ref[...]   # (TB, 1)

    # Exact sigmoid; exp goes to the EUP, the divide is on a (TB, 1) slab only.
    o_ref[...] = (1.0 / (1.0 + jnp.exp(-logit))).astype(o_ref.dtype)


def discriminator_forward(x, params, *, block_batch=4096):
    """Fused MLP forward pass on TPU via Pallas.

    x: (B, input_dim) float32
    params: dict with w1 (D,H), b1 (1,H), w2 (H,H), b2 (1,H), w3 (H,O=1), b3 (1,1)
    returns: (B, 1) float32
    """
    w1, b1, w2, b2, w3, b3 = (params[k] for k in ("w1", "b1", "w2", "b2", "w3", "b3"))
    B, D = x.shape
    H = w1.shape[1]
    O = w3.shape[1]
    assert O == 1, "Discriminator output_dim is 1"

    # Batch tiling: tile multiple of 16 (bf16 sublane packing); pad B up to it.
    Bp16 = _round_up(B, 16)
    TB = min(block_batch, Bp16)
    # Keep >= 2 grid steps when the batch allows it, so the "parallel" batch
    # axis can shard across both TensorCores on v7x (no-op on v5e/v6e).
    if Bp16 >= 32:
        TB = min(TB, _round_up(pl.cdiv(Bp16, 2), 16))
    Bp = _round_up(B, TB)
    xp = x if Bp == B else jnp.pad(x, ((0, Bp - B), (0, 0)))

    # bf16 MXU inputs for layers 1/2 (halves HBM traffic on the x stream);
    # biases and the layer-3 row stay f32 (VPU path).
    xp = xp.astype(jnp.bfloat16)
    w1 = w1.astype(jnp.bfloat16)
    w2 = w2.astype(jnp.bfloat16)
    b1 = b1.astype(jnp.float32)
    b2 = b2.astype(jnp.float32)
    w3row = w3.astype(jnp.float32).T.reshape(1, H)   # (1, H) row for VPU mul
    b3 = b3.astype(jnp.float32).reshape(1, 1)

    # Constant index_map => block stays VMEM-resident across grid iterations.
    resident = lambda a: pl.BlockSpec(a.shape, lambda i: (0,) * a.ndim)

    # Scoped-VMEM budget: weights (double-buffered by default) + x/out tiles
    # (double-buffered) + f32/bf16 intermediates, with 2x headroom.
    weight_bytes = (D * H + H * H) * 2 + (2 * H + H + 1) * 4
    tile_bytes = TB * D * 2 + TB * 1 * 4
    inter_bytes = TB * H * 6                  # f32 + bf16 copies of h
    need = 2 * (weight_bytes + tile_bytes) + inter_bytes
    vmem_limit = int(min(max(2 * need, 32 * 1024 * 1024), 64 * 1024 * 1024))

    cost = pl.CostEstimate(
        flops=2 * Bp * (D * H + H * H + H * 1),
        transcendentals=Bp * 1,
        bytes_accessed=(Bp * D * 2              # x (bf16)
                        + (D * H + H * H) * 2   # w1, w2 (bf16)
                        + (2 * H + H + 1) * 4   # b1, b2, w3 row, b3 (f32)
                        + Bp * 1 * 4),          # output (f32)
    )

    out = pl.pallas_call(
        _discriminator_kernel,
        out_shape=jax.ShapeDtypeStruct((Bp, 1), jnp.float32),
        grid=(Bp // TB,),
        in_specs=[
            pl.BlockSpec((TB, D), lambda i: (i, 0)),     # x: streamed over the batch
            resident(w1), resident(b1),
            resident(w2), resident(b2),
            resident(w3row), resident(b3),
        ],
        out_specs=pl.BlockSpec((TB, 1), lambda i: (i, 0)),
        compiler_params=pltpu.CompilerParams(
            dimension_semantics=("parallel",),            # megacore sharding on v7x
            vmem_limit_bytes=vmem_limit,
        ),
        cost_estimate=cost,
    )(xp, w1, b1, w2, b2, w3row, b3)

    return out[:B, :]


def init_params(key, input_dim, hidden_dim=256, output_dim=1):
    """Deterministic synthetic init (PyTorch-style uniform ranges), stored as (in, out)."""
    ks = jax.random.split(key, 6)

    def lin(kw, kb, fan_in, fan_out):
        bound = 1.0 / jnp.sqrt(fan_in)
        w = jax.random.uniform(kw, (fan_in, fan_out), jnp.float32, -bound, bound)
        b = jax.random.uniform(kb, (1, fan_out), jnp.float32, -bound, bound)
        return w, b

    w1, b1 = lin(ks[0], ks[1], input_dim, hidden_dim)
    w2, b2 = lin(ks[2], ks[3], hidden_dim, hidden_dim)
    w3, b3 = lin(ks[4], ks[5], hidden_dim, output_dim)
    return {"w1": w1, "b1": b1, "w2": w2, "b2": b2, "w3": w3, "b3": b3}


def discriminator_reference(x, p):
    """Plain-JAX reference mirroring the kernel's numerics
    (bf16 MXU inputs / f32 accumulation for layers 1-2, f32 dot for layer 3)."""
    bf = jnp.bfloat16
    h = jnp.dot(x.astype(bf), p["w1"].astype(bf), preferred_element_type=jnp.float32) + p["b1"]
    h = jnp.maximum(h, 0.2 * h)
    h = jnp.dot(h.astype(bf), p["w2"].astype(bf), preferred_element_type=jnp.float32) + p["b2"]
    h = jnp.maximum(h, 0.2 * h)
    logit = jnp.sum(h * p["w3"].T.reshape(1, -1), axis=-1, keepdims=True) + p["b3"].reshape(1, 1)
    return jax.nn.sigmoid(logit)


if __name__ == "__main__":
    key = jax.random.PRNGKey(0)
    k_x, k_p = jax.random.split(key)

    # Small shapes; batch deliberately not a multiple of the tile to exercise
    # padding and the >=2-step grid path (B=100 -> TB=64, grid=2).
    batch, input_dim, hidden_dim, output_dim = 100, 32, 256, 1
    x = jax.random.normal(k_x, (batch, input_dim), dtype=jnp.float32)
    params = init_params(k_p, input_dim, hidden_dim, output_dim)

    out = discriminator_forward(x, params)
    out = jax.block_until_ready(out)

    ref = discriminator_reference(x, params)
    assert out.shape == (batch, output_dim), out.shape
    assert jnp.allclose(out, ref, atol=2e-3, rtol=2e-3), float(jnp.max(jnp.abs(out - ref)))

    print("KERNEL_OK")
</pallas_src>

<mosaic_0001>
module attributes {stable_mosaic.version = 11 : i64} {
  func.func @_discriminator_kernel(%arg0: i32, %arg1: memref<64x32xbf16, #tpu.memory_space<vmem>>, %arg2: memref<32x256xbf16, #tpu.memory_space<vmem>>, %arg3: memref<1x256xf32, #tpu.memory_space<vmem>>, %arg4: memref<256x256xbf16, #tpu.memory_space<vmem>>, %arg5: memref<1x256xf32, #tpu.memory_space<vmem>>, %arg6: memref<1x256xf32, #tpu.memory_space<vmem>>, %arg7: memref<1x1xf32, #tpu.memory_space<vmem>>, %arg8: memref<64x1xf32, #tpu.memory_space<vmem>>) attributes {dimension_semantics = [#tpu.dimension_semantics<parallel>], iteration_bounds = array<i64: 2>, scalar_prefetch = 0 : i64, scratch_operands = 0 : i64, tpu.core_type = #tpu.core_type<tc>, window_params = [{transform_indices = @transform_0, window_bounds = array<i64: 64, 32>}, {pipeline_mode = #tpu.pipeline_mode<synchronous>, transform_indices = @transform_1, window_bounds = array<i64: 32, 256>}, {pipeline_mode = #tpu.pipeline_mode<synchronous>, transform_indices = @transform_2, window_bounds = array<i64: 1, 256>}, {pipeline_mode = #tpu.pipeline_mode<synchronous>, transform_indices = @transform_3, window_bounds = array<i64: 256, 256>}, {pipeline_mode = #tpu.pipeline_mode<synchronous>, transform_indices = @transform_4, window_bounds = array<i64: 1, 256>}, {pipeline_mode = #tpu.pipeline_mode<synchronous>, transform_indices = @transform_5, window_bounds = array<i64: 1, 256>}, {pipeline_mode = #tpu.pipeline_mode<synchronous>, transform_indices = @transform_6, window_bounds = array<i64: 1, 1>}, {transform_indices = @transform_7, window_bounds = array<i64: 64, 1>}]} {
    %c0 = arith.constant 0 : index
    %c0_0 = arith.constant 0 : index
    %0 = vector.load %arg1[%c0, %c0_0] : memref<64x32xbf16, #tpu.memory_space<vmem>>, vector<64x32xbf16>
    %c0_1 = arith.constant 0 : index
    %c0_2 = arith.constant 0 : index
    %1 = vector.load %arg2[%c0_1, %c0_2] : memref<32x256xbf16, #tpu.memory_space<vmem>>, vector<32x256xbf16>
    %cst = arith.constant dense<0.000000e+00> : vector<64x256xf32>
    %2 = tpu.matmul %0, %1, %cst {dimension_numbers = #tpu.dot_dimension_numbers<[1], [0], [0], [1], [0, 0, 1, 1], [], []>} : vector<64x32xbf16>, vector<32x256xbf16>, vector<64x256xf32> -> vector<64x256xf32>
    %c0_3 = arith.constant 0 : index
    %c0_4 = arith.constant 0 : index
    %3 = vector.load %arg3[%c0_3, %c0_4] : memref<1x256xf32, #tpu.memory_space<vmem>>, vector<1x256xf32>
    %4 = vector.broadcast %3 : vector<1x256xf32> to vector<64x256xf32>
    %5 = arith.addf %2, %4 : vector<64x256xf32>
    %cst_5 = arith.constant 2.000000e-01 : f32
    %6 = vector.broadcast %cst_5 : f32 to vector<64x256xf32>
    %7 = arith.mulf %6, %5 : vector<64x256xf32>
    %8 = arith.maximumf %5, %7 : vector<64x256xf32>
    %9 = arith.truncf %8 : vector<64x256xf32> to vector<64x256xbf16>
    %c0_6 = arith.constant 0 : index
    %c0_7 = arith.constant 0 : index
    %10 = vector.load %arg4[%c0_6, %c0_7] : memref<256x256xbf16, #tpu.memory_space<vmem>>, vector<256x256xbf16>
    %cst_8 = arith.constant dense<0.000000e+00> : vector<64x256xf32>
    %11 = tpu.matmul %9, %10, %cst_8 {dimension_numbers = #tpu.dot_dimension_numbers<[1], [0], [0], [1], [0, 0, 1, 1], [], []>} : vector<64x256xbf16>, vector<256x256xbf16>, vector<64x256xf32> -> vector<64x256xf32>
    %c0_9 = arith.constant 0 : index
    %c0_10 = arith.constant 0 : index
    %12 = vector.load %arg5[%c0_9, %c0_10] : memref<1x256xf32, #tpu.memory_space<vmem>>, vector<1x256xf32>
    %13 = vector.broadcast %12 : vector<1x256xf32> to vector<64x256xf32>
    %14 = arith.addf %11, %13 : vector<64x256xf32>
    %cst_11 = arith.constant 2.000000e-01 : f32
    %15 = vector.broadcast %cst_11 : f32 to vector<64x256xf32>
    %16 = arith.mulf %15, %14 : vector<64x256xf32>
    %17 = arith.maximumf %14, %16 : vector<64x256xf32>
    %c0_12 = arith.constant 0 : index
    %c0_13 = arith.constant 0 : index
    %18 = vector.load %arg6[%c0_12, %c0_13] : memref<1x256xf32, #tpu.memory_space<vmem>>, vector<1x256xf32>
    %19 = vector.broadcast %18 : vector<1x256xf32> to vector<64x256xf32>
    %20 = arith.mulf %17, %19 : vector<64x256xf32>
    %cst_14 = arith.constant dense<0.000000e+00> : vector<64xf32>
    %21 = vector.multi_reduction <add>, %20, %cst_14 [1] : vector<64x256xf32> to vector<64xf32>
    %22 = vector.shape_cast %21 : vector<64xf32> to vector<64x1xf32>
    %c0_15 = arith.constant 0 : index
    %c0_16 = arith.constant 0 : index
    %23 = vector.load %arg7[%c0_15, %c0_16] : memref<1x1xf32, #tpu.memory_space<vmem>>, vector<1x1xf32>
    %24 = vector.broadcast %23 : vector<1x1xf32> to vector<64x1xf32>
    %25 = arith.addf %22, %24 : vector<64x1xf32>
    %cst_17 = arith.constant 0.000000e+00 : f32
    %26 = vector.broadcast %cst_17 : f32 to vector<64x1xf32>
    %27 = arith.subf %26, %25 : vector<64x1xf32>
    %28 = math.exp %27 : vector<64x1xf32>
    %cst_18 = arith.constant 1.000000e+00 : f32
    %29 = vector.broadcast %cst_18 : f32 to vector<64x1xf32>
    %30 = arith.addf %29, %28 : vector<64x1xf32>
    %cst_19 = arith.constant 1.000000e+00 : f32
    %31 = vector.broadcast %cst_19 : f32 to vector<64x1xf32>
    %32 = arith.divf %31, %30 : vector<64x1xf32>
    %c0_20 = arith.constant 0 : index
    %c0_21 = arith.constant 0 : index
    %33 = vector.load %arg8[%c0_20, %c0_21] : memref<64x1xf32, #tpu.memory_space<vmem>>, vector<64x1xf32>
    tpu.vector_store %arg8[%c0_20, %c0_21], %32 {strides = array<i32>} : memref<64x1xf32, #tpu.memory_space<vmem>>, vector<64x1xf32>,
    return
  }
  func.func @transform_0(%arg0: i32) -> (i32, i32) {
    %c0_i32 = arith.constant 0 : i32
    %c0_i32_0 = arith.constant 0 : i32
    return %arg0, %c0_i32 : i32, i32
  }
  func.func @transform_1(%arg0: i32) -> (i32, i32) {
    %c0_i32 = arith.constant 0 : i32
    %c0_i32_0 = arith.constant 0 : i32
    %c0_i32_1 = arith.constant 0 : i32
    return %c0_i32, %c0_i32_0 : i32, i32
  }
  func.func @transform_2(%arg0: i32) -> (i32, i32) {
    %c0_i32 = arith.constant 0 : i32
    %c0_i32_0 = arith.constant 0 : i32
    %c0_i32_1 = arith.constant 0 : i32
    return %c0_i32, %c0_i32_0 : i32, i32
  }
  func.func @transform_3(%arg0: i32) -> (i32, i32) {
    %c0_i32 = arith.constant 0 : i32
    %c0_i32_0 = arith.constant 0 : i32
    %c0_i32_1 = arith.constant 0 : i32
    return %c0_i32, %c0_i32_0 : i32, i32
  }
  func.func @transform_4(%arg0: i32) -> (i32, i32) {
    %c0_i32 = arith.constant 0 : i32
    %c0_i32_0 = arith.constant 0 : i32
    %c0_i32_1 = arith.constant 0 : i32
    return %c0_i32, %c0_i32_0 : i32, i32
  }
  func.func @transform_5(%arg0: i32) -> (i32, i32) {
    %c0_i32 = arith.constant 0 : i32
    %c0_i32_0 = arith.constant 0 : i32
    %c0_i32_1 = arith.constant 0 : i32
    return %c0_i32, %c0_i32_0 : i32, i32
  }
  func.func @transform_6(%arg0: i32) -> (i32, i32) {
    %c0_i32 = arith.constant 0 : i32
    %c0_i32_0 = arith.constant 0 : i32
    %c0_i32_1 = arith.constant 0 : i32
    return %c0_i32, %c0_i32_0 : i32, i32
  }
  func.func @transform_7(%arg0: i32) -> (i32, i32) {
    %c0_i32 = arith.constant 0 : i32
    %c0_i32_0 = arith.constant 0 : i32
    return %arg0, %c0_i32 : i32, i32
  }
}

</mosaic_0001>

<bundles_post_ra>
// kernel: tpu_custom_call.1
= control target key start
LH: loop header
LB: loop body
LE: loop exit
PB: predicated region body
PF: predicated region fallthrough
CT: control target
= control target key end

     0   :  { %s1630_s0 = inlined_call_operand.vmem [shape: bf16[128,32], index: 0, kind: input, shape index: {}]   ;;  %s1631_s1 = inlined_call_operand.vmem [shape: bf16[32,256], index: 1, kind: input, shape index: {}]   ;;  %s1632_s2 = inlined_call_operand.vmem [shape: f32[1,256], index: 2, kind: input, shape index: {}]   ;;  %s1633_s3 = inlined_call_operand.hbm [shape: bf16[256,256], index: 3, kind: input, shape index: {}]   ;;  %s1634_s4 = inlined_call_operand.vmem [shape: f32[1,256], index: 4, kind: input, shape index: {}]   ;;  %s1635_s5 = inlined_call_operand.vmem [shape: f32[1,256], index: 5, kind: input, shape index: {}]   ;;  %s1636_s6 = inlined_call_operand.<no memory space> [shape: f32[1,1], index: 6, kind: input, shape index: {}]   ;;  %s1637_s7 = inlined_call_operand.vmem [shape: f32[128,1], index: 7, kind: output, shape index: {}]  }
   0x1   :  { %v12_v0 = vstv %s1636_s6 }
   0x2   :  { %13 = vst [vmem:[#allocation2] sm:$0x1] %v12_v0 }
   0x3   :  { %14 = vsyncpa [#allocation4], 0  ;;  %s1471_s26 = smov 0  }
   0x4 LB: > { %s220_s29 = sshll.u32 %s1633_s3, 4  ;;  %s1104_s30 = sadd.s32 4294967295, %s1423_s26   ;;  %s1423_s26 = sphi %s1471_s26, %s20_s26   ;;  %s221_s29 = int_to_ptr.hbm [resolvable:$true] %s220_s29 }
   0x5   : > { %p1106_p0 = scmp.ge.s32.totalorder %s1423_s26, 1  ;;  %p203_p1 = scmp.lt.s32.totalorder %s1423_s26, 3 }
   0x6   : > { %p1337_p2 = scmp.eq.s32.totalorder %s1104_s30, 0  ;;  %s1425_s6 = smov [#allocation3]  }
   0x7   : > { %p204_p3 = pnand %p1106_p0, %p203_p1  ;;  %s222_s8 = sshll.u32 %s1425_s6, 4  ;;  %s223_s8 = int_to_ptr.vmem [resolvable:$true] %s222_s8 }
   0x8   : > { %s1426_s9 = smov 128   ;;  %s1427_s10 = smov 8  }
   0x9   : > { %p1333_p4 = pneg %p204_p3  ;;  %256 = sbr.rel (%p204_p3) target bundleno = 517 (0x205), region = 48 }
   0xb   : > { %p1334_p5 = pnand %p1337_p2, %p1333_p4 }
   0xd   : > { %1336 = dma.hbm_to_vmem [thread:$0]  (!%p1334_p5), %s221_s29, 4096, %s223_s8, [#allocation4], %s1426_s9, %s1426_s9, %s1427_s10  }
   0xe   : > { %1418 = dma.done.wait (%p1337_p2), [#allocation4], 4096  }
   0xf   : > { %1420 = vsyncadd (%p1337_p2), [#allocation4], 4294963200  ;;  %s1111_s11 = sshll.u32 %s1104_s30, 3  ;;  %v1141_v1 = vld [vmem:[%s1631_s1 + $0x10] sm:$0xf]  ;;  %vm360_vm0 = vcmask 261120  }
  0x10   : > { %p290_p6 = scmp.lt.s32.totalorder %s1111_s11, 15  ;;  %v1292_v2 = vld [vmem:[%s1631_s1 + $0x14] sm:$0xf0]  ;;  %v1291_v3 = vld [vmem:[%s1631_s1 + $0x14] sm:$0xf]  ;;  %vm1027_vm3 = vcmask 7168  }
  0x11   : > { %v1142_v4 = vor.u32 %v1292_v2, %v1141_v1  ;;  %v1143_v5 = vld [vmem:[%s1631_s1 + $0x18] sm:$0xf0]  ;;  %v1133_v6 = vld [vmem:[%s1631_s1] sm:$0xf]  ;;  %v1290_v7 = vld [vmem:[%s1631_s1 + $0x4] sm:$0xf0] }
  0x12   : > { %s1639_s11 = smov (!%p290_p6, %s1111_s11), 15  ;;  %v1146_v8 = vor.u32 %v1291_v3, %v1143_v5  ;;  %v1289_v9 = vld [vmem:[%s1631_s1 + $0x4] sm:$0xf]  ;;  %v1135_v10 = vld [vmem:[%s1631_s1 + $0x8] sm:$0xf0]  ;;  %v1134_v11 = vor.u32 %v1290_v7, %v1133_v6 }
  0x13   : > { %s1112_s12 = sshll.u32 %s1639_s11, 2  ;;  %379 = vmatpush.bf16.msra.mxu0 %v1142_v4  ;;  %1325 = vmatpush.bf16.msra.mxu2 %v1142_v4  ;;  %v1138_v12 = vor.u32 %v1289_v9, %v1135_v10  ;;  %v1213_v15 = vld [vmem:[#allocation3 + $0x70] sm:$0xf]  ;;  %v1308_v16 = vld [vmem:[#allocation3 + $0x74] sm:$0xf0]  ;;  %s1114_s16 = sshll.u32 %s1639_s11, 3 }
  0x14   : > { %s1506_s28 = scalar_lea.vmem %s1630_s0, %s1112_s12  ;;  %408 = vmatpush.bf16.msra.mxu1 %v1146_v8  ;;  %1327 = vmatpush.bf16.msra.mxu3 %v1146_v8  ;;  %v1277_v17 = vld [vmem:[#allocation3 + $0xf0] sm:$0xf]  ;;  %v1214_v18 = vor.u32 %v1308_v16, %v1213_v15  ;;  %v1324_v19 = vld [vmem:[#allocation3 + $0xf4] sm:$0xf0]  ;;  %v1307_v20 = vld [vmem:[#allocation3 + $0x74] sm:$0xf]  ;;  %s1605_s19 = scalar_lea.vmem %s1637_s7, %s1114_s16 }
  0x15   : > { %v1285_v13 = vld [vmem:[%s1506_s28] sm:$0xff]  ;;  %v1287_v14 = vld [vmem:[%s1506_s28 + $0x10] sm:$0xff]  ;;  %v1278_v22 = vor.u32 %v1324_v19, %v1277_v17  ;;  %v1306_v26 = vld [vmem:[#allocation3 + $0x64] sm:$0xf0] }
  0x16   : > { %v1215_v21 = vld [vmem:[#allocation3 + $0x78] sm:$0xf0]  ;;  %v1323_v23 = vld [vmem:[#allocation3 + $0xf4] sm:$0xf]  ;;  %v1205_v25 = vld [vmem:[#allocation3 + $0x60] sm:$0xf] }
  0x17   : > { %v1279_v24 = vld [vmem:[#allocation3 + $0xf8] sm:$0xf0]  ;;  %380 = vmatpush.bf16.msra.mxu0 %v1134_v11  ;;  %1326 = vmatpush.bf16.msra.mxu2 %v1134_v11  ;;  %v1269_v27 = vld [vmem:[#allocation3 + $0xe0] sm:$0xf]  ;;  %v1322_v28 = vld [vmem:[#allocation3 + $0xe4] sm:$0xf0]  ;;  %v1218_v29 = vor.u32 %v1307_v20, %v1215_v21  ;;  %v1206_v33 = vor.u32 %v1306_v26, %v1205_v25 }
  0x18   : > { %409 = vmatpush.bf16.msra.mxu1 %v1138_v12  ;;  %1328 = vmatpush.bf16.msra.mxu3 %v1138_v12  ;;  %v1282_v30 = vor.u32 %v1323_v23, %v1279_v24  ;;  %v1305_v31 = vld [vmem:[#allocation3 + $0x64] sm:$0xf]  ;;  %v1207_v32 = vld [vmem:[#allocation3 + $0x68] sm:$0xf0]  ;;  %v1270_v34 = vor.u32 %v1322_v28, %v1269_v27  ;;  %v1197_v37 = vld [vmem:[#allocation3 + $0x50] sm:$0xf] }
  0x19   : > { %v1321_v35 = vld [vmem:[#allocation3 + $0xe4] sm:$0xf]  ;;  %v1271_v36 = vld [vmem:[#allocation3 + $0xe8] sm:$0xf0]  ;;  %v1304_v38 = vld [vmem:[#allocation3 + $0x54] sm:$0xf0]  ;;  %v1210_v41 = vor.u32 %v1305_v31, %v1207_v32 }
  0x1a   : > { %1147 = vmatmul.msk.bf16.vlgmr.msra.gmra.mxu0 %vm360_vm0, %v1285_v13  ;;  %1149 = vmatmul.msk.bf16.vlgmr.msra.gmra.mxu2 %vm360_vm0, %v1287_v14  ;;  %v1261_v39 = vld [vmem:[#allocation3 + $0xd0] sm:$0xf]  ;;  %v1320_v40 = vld [vmem:[#allocation3 + $0xd4] sm:$0xf0]  ;;  %v1274_v42 = vor.u32 %v1321_v35, %v1271_v36  ;;  %v1303_v43 = vld [vmem:[#allocation3 + $0x54] sm:$0xf]  ;;  %v1198_v45 = vor.u32 %v1304_v38, %v1197_v37 }
  0x1b   : > { %669 = vmatpush.bf16.msrb.mxu2 %v1214_v18  ;;  %1151 = vmatmul.msk.bf16.vlgmr.msra.gmra.mxu1 %vm360_vm0, %v1285_v13  ;;  %v1199_v44 = vld [vmem:[#allocation3 + $0x58] sm:$0xf0]  ;;  %v1262_v46 = vor.u32 %v1320_v40, %v1261_v39  ;;  %v1319_v47 = vld [vmem:[#allocation3 + $0xd4] sm:$0xf]  ;;  %v1189_v49 = vld [vmem:[#allocation3 + $0x40] sm:$0xf] }
  0x1c   : > { %698 = vmatpush.bf16.msrb.mxu3 %v1278_v22  ;;  %727 = vmatpush.bf16.msrb.mxu0 %v1218_v29  ;;  %v1263_v48 = vld [vmem:[#allocation3 + $0xd8] sm:$0xf0]  ;;  %v1302_v50 = vld [vmem:[#allocation3 + $0x44] sm:$0xf0]  ;;  %v1253_v51 = vld [vmem:[#allocation3 + $0xc0] sm:$0xf]  ;;  %v1202_v53 = vor.u32 %v1303_v43, %v1199_v44 }
  0x1d   : > { %1153 = vmatmul.msk.bf16.vlgmr.msra.gmra.mxu3 %vm360_vm0, %v1287_v14  ;;  %756 = vmatpush.bf16.msrb.mxu1 %v1282_v30  ;;  %v1318_v52 = vld [vmem:[#allocation3 + $0xc4] sm:$0xf0]  ;;  %v1266_v54 = vor.u32 %v1319_v47, %v1263_v48  ;;  %v1301_v55 = vld [vmem:[#allocation3 + $0x44] sm:$0xf]  ;;  %v1190_v56 = vor.u32 %v1302_v50, %v1189_v49  ;;  %v1191_v58 = vld [vmem:[#allocation3 + $0x48] sm:$0xf0] }
  0x1e   : > { %v1254_v57 = vor.u32 %v1318_v52, %v1253_v51  ;;  %v1317_v59 = vld [vmem:[#allocation3 + $0xc4] sm:$0xf]  ;;  %v1255_v60 = vld [vmem:[#allocation3 + $0xc8] sm:$0xf0]  ;;  %v1194_v61 = vor.u32 %v1301_v55, %v1191_v58  ;;  %v1288_v0 = vld [vmem:[%s1506_s28 + $0x18] sm:$0xff] }
  0x1f   : > { %670 = vmatpush.bf16.msrb.mxu2 %v1206_v33  ;;  %v1258_v62 = vor.u32 %v1317_v59, %v1255_v60  ;;  %v1286_v63 = vld [vmem:[%s1506_s28 + $0x8] sm:$0xff]  ;;  %v1181_v1 = vld [vmem:[#allocation3 + $0x30] sm:$0xf]  ;;  %v1300_v2 = vld [vmem:[#allocation3 + $0x34] sm:$0xf0] }
  0x20   : > { %699 = vmatpush.bf16.msrb.mxu3 %v1270_v34  ;;  %728 = vmatpush.bf16.msrb.mxu0 %v1210_v41  ;;  %v1182_v3 = vor.u32 %v1300_v2, %v1181_v1  ;;  %v1245_v4 = vld [vmem:[#allocation3 + $0xb0] sm:$0xf]  ;;  %v1316_v5 = vld [vmem:[#allocation3 + $0xb4] sm:$0xf0]  ;;  %v1299_v6 = vld [vmem:[#allocation3 + $0x34] sm:$0xf] }
  0x21   : > { %757 = vmatpush.bf16.msrb.mxu1 %v1274_v42  ;;  %v1246_v7 = vor.u32 %v1316_v5, %v1245_v4  ;;  %v1183_v8 = vld [vmem:[#allocation3 + $0x38] sm:$0xf0]  ;;  %v1315_v9 = vld [vmem:[#allocation3 + $0xb4] sm:$0xf]  ;;  %v1173_v13 = vld [vmem:[#allocation3 + $0x20] sm:$0xf] }
  0x22   : > { %v1247_v10 = vld [vmem:[#allocation3 + $0xb8] sm:$0xf0]  ;;  %v1186_v11 = vor.u32 %v1299_v6, %v1183_v8  ;;  %v1298_v14 = vld [vmem:[#allocation3 + $0x24] sm:$0xf0]  ;;  %v1237_v15 = vld [vmem:[#allocation3 + $0xa0] sm:$0xf] }
  0x23   : > { %671 = vmatpush.bf16.msrb.mxu2 %v1198_v45  ;;  %v1250_v12 = vor.u32 %v1315_v9, %v1247_v10  ;;  %v1174_v16 = vor.u32 %v1298_v14, %v1173_v13  ;;  %v1314_v17 = vld [vmem:[#allocation3 + $0xa4] sm:$0xf0]  ;;  %v1297_v18 = vld [vmem:[#allocation3 + $0x24] sm:$0xf]  ;;  %v1175_v19 = vld [vmem:[#allocation3 + $0x28] sm:$0xf0] }
  0x24   : > { %700 = vmatpush.bf16.msrb.mxu3 %v1262_v46  ;;  %729 = vmatpush.bf16.msrb.mxu0 %v1202_v53  ;;  %v1238_v20 = vor.u32 %v1314_v17, %v1237_v15  ;;  %v1178_v21 = vor.u32 %v1297_v18, %v1175_v19  ;;  %v1313_v22 = vld [vmem:[#allocation3 + $0xa4] sm:$0xf]  ;;  %v1239_v23 = vld [vmem:[#allocation3 + $0xa8] sm:$0xf0]  ;;  %v1165_v25 = vld [vmem:[#allocation3 + $0x10] sm:$0xf] }
  0x25   : > { %758 = vmatpush.bf16.msrb.mxu1 %v1266_v54  ;;  %v1242_v24 = vor.u32 %v1313_v22, %v1239_v23  ;;  %v1296_v26 = vld [vmem:[#allocation3 + $0x14] sm:$0xf0]  ;;  %v1229_v27 = vld [vmem:[#allocation3 + $0x90] sm:$0xf]  ;;  %v1295_v30 = vld [vmem:[#allocation3 + $0x14] sm:$0xf] }
  0x26   : > { %v1166_v28 = vor.u32 %v1296_v26, %v1165_v25  ;;  %v1312_v29 = vld [vmem:[#allocation3 + $0x94] sm:$0xf0]  ;;  %v1167_v31 = vld [vmem:[#allocation3 + $0x18] sm:$0xf0]  ;;  %v1311_v34 = vld [vmem:[#allocation3 + $0x94] sm:$0xf] }
  0x27   : > { %672 = vmatpush.bf16.msrb.mxu2 %v1190_v56  ;;  %v1230_v32 = vor.u32 %v1312_v29, %v1229_v27  ;;  %v1170_v33 = vor.u32 %v1295_v30, %v1167_v31  ;;  %v1231_v35 = vld [vmem:[#allocation3 + $0x98] sm:$0xf0]  ;;  %v1157_v37 = vld [vmem:[#allocation3] sm:$0xf]  ;;  %v1294_v38 = vld [vmem:[#allocation3 + $0x4] sm:$0xf0] }
  0x28   : > { %701 = vmatpush.bf16.msrb.mxu3 %v1254_v57  ;;  %730 = vmatpush.bf16.msrb.mxu0 %v1194_v61  ;;  %v1234_v36 = vor.u32 %v1311_v34, %v1231_v35  ;;  %v1221_v39 = vld [vmem:[#allocation3 + $0x80] sm:$0xf]  ;;  %v1158_v40 = vor.u32 %v1294_v38, %v1157_v37  ;;  %v1310_v41 = vld [vmem:[#allocation3 + $0x84] sm:$0xf0]  ;;  %v1293_v42 = vld [vmem:[#allocation3 + $0x4] sm:$0xf] }
  0x29   : > { %759 = vmatpush.bf16.msrb.mxu1 %v1258_v62  ;;  %v1159_v43 = vld [vmem:[#allocation3 + $0x8] sm:$0xf0]  ;;  %v1222_v44 = vor.u32 %v1310_v41, %v1221_v39  ;;  %v1309_v46 = vld [vmem:[#allocation3 + $0x84] sm:$0xf]  ;;  %v314_v49 = vld [vmem:[%s1632_s2] sm:$0x3] }
  0x2a   : > { %1148 = vmatmul.msk.bf16.gmra.mxu0 %vm360_vm0, %v1286_v63  ;;  %1150 = vmatmul.msk.bf16.gmra.mxu2 %vm360_vm0, %v1288_v0  ;;  %v1162_v45 = vor.u32 %v1293_v42, %v1159_v43  ;;  %v1223_v47 = vld [vmem:[#allocation3 + $0x88] sm:$0xf0]  ;;  %v1529_v51 = vperm.slane %v314_v49, 0  ;;  %v1531_v53 = vperm.slane %v314_v49, 1 }
  0x2b   : > { %1152 = vmatmul.msk.bf16.gmra.mxu1 %vm360_vm0, %v1286_v63  ;;  %673 = vmatpush.bf16.msrb.mxu2 %v1182_v3  ;;  %v1226_v48 = vor.u32 %v1309_v46, %v1223_v47 }
  0x2c   : > { %702 = vmatpush.bf16.msrb.mxu3 %v1246_v7  ;;  %731 = vmatpush.bf16.msrb.mxu0 %v1186_v11 }
  0x2d   : > { %1154 = vmatmul.msk.bf16.gmra.mxu3 %vm360_vm0, %v1288_v0  ;;  %760 = vmatpush.bf16.msrb.mxu1 %v1250_v12 }
  0x2f   : > { %674 = vmatpush.bf16.msrb.mxu2 %v1174_v16 }
  0x30   : > { %703 = vmatpush.bf16.msrb.mxu3 %v1238_v20  ;;  %732 = vmatpush.bf16.msrb.mxu0 %v1178_v21 }
  0x31   : > { %761 = vmatpush.bf16.msrb.mxu1 %v1242_v24 }
  0x33   : > { %675 = vmatpush.bf16.msrb.mxu2 %v1166_v28 }
  0x34   : > { %704 = vmatpush.bf16.msrb.mxu3 %v1230_v32  ;;  %733 = vmatpush.bf16.msrb.mxu0 %v1170_v33 }
  0x35   : > { %762 = vmatpush.bf16.msrb.mxu1 %v1234_v36 }
  0x37   : > { %676 = vmatpush.bf16.msrb.mxu2 %v1158_v40 }
  0x38   : > { %705 = vmatpush.bf16.msrb.mxu3 %v1222_v44  ;;  %734 = vmatpush.bf16.msrb.mxu0 %v1162_v45 }
  0x39   : > { %763 = vmatpush.bf16.msrb.mxu1 %v1226_v48 }
  0x97   : > { %v382_v50 = vpop.f32.mrf.mxu0 }
  0x98   : > { %v411_v52 = vpop.f32.mrf.mxu1  ;;  %v383_v54 = vadd.f32 %v382_v50, %v1529_v51 }
  0x99   : > { %v412_v55 = vadd.f32 %v411_v52, %v1531_v53 }
  0x9a   : > { %v431_v57 = vmul.f32 0.2, %v383_v54 }
  0x9b   : > { %v432_v60 = vmul.f32 0.2, %v412_v55 }
  0x9c   : > { %v447_v0 = vmax.f32 %v383_v54, %v431_v57 }
  0x9d   : > { %v448_v2 = vmax.f32 %v412_v55, %v432_v60  ;;  %v392_v8 = vpop.f32.mrf.mxu2 }
  0x9e   : > { %v393_v28 = vadd.f32 %v392_v8, %v1529_v51 }
  0x9f   : > { %v384_v56 = vpop.f32.mrf.mxu0 }
  0xa0   : > { %v385_v58 = vadd.f32 %v384_v56, %v1529_v51  ;;  %v413_v59 = vpop.f32.mrf.mxu1  ;;  %v421_v9 = vpop.f32.mrf.mxu3  ;;  %v439_v33 = vmul.f32 0.2, %v393_v28 }
  0xa1   : > { %v414_v61 = vadd.f32 %v413_v59, %v1531_v53  ;;  %v422_v30 = vadd.f32 %v421_v9, %v1531_v53 }
  0xa2   : > { %v433_v62 = vmul.f32 0.2, %v385_v58  ;;  %v455_v38 = vmax.f32 %v393_v28, %v439_v33 }
  0xa3   : > { %v434_v63 = vmul.f32 0.2, %v414_v61  ;;  %v440_v36 = vmul.f32 0.2, %v422_v30 }
  0xa4   : > { %v449_v1 = vmax.f32 %v385_v58, %v433_v62 }
  0xa5   : > { %v450_v3 = vmax.f32 %v414_v61, %v434_v63  ;;  %v394_v20 = vpop.f32.mrf.mxu2  ;;  %v456_v40 = vmax.f32 %v422_v30, %v440_v36 }
  0xa6   : > { %v463_v4 = vpack.c.bf16 %v449_v1, %v447_v0  ;;  %v395_v29 = vadd.f32 %v394_v20, %v1529_v51 }
  0xa7   : > { %v387_v5 = vpop.f32.mrf.mxu0  ;;  %v464_v6 = vpack.c.bf16 %v450_v3, %v448_v2 }
  0xa8   : > { %v416_v7 = vpop.f32.mrf.mxu1  ;;  %677 = vmatmul.bf16.vlgmr.msrb.gmra.mxu2 %v463_v4  ;;  %735 = vmatmul.bf16.vlgmr.msrb.gmra.mxu0 %v463_v4  ;;  %v388_v10 = vadd.f32 %v387_v5, %v1529_v51  ;;  %v423_v23 = vpop.f32.mrf.mxu3  ;;  %v441_v34 = vmul.f32 0.2, %v395_v29 }
  0xa9   : > { %706 = vmatmul.bf16.vlgmr.msrb.gmra.mxu3 %v464_v6  ;;  %764 = vmatmul.bf16.vlgmr.msrb.gmra.mxu1 %v464_v6  ;;  %v417_v11 = vadd.f32 %v416_v7, %v1531_v53  ;;  %v424_v31 = vadd.f32 %v423_v23, %v1531_v53  ;;  %v817_v7 = vld [vmem:[%s1635_s5] sm:$0x3] }
  0xaa   : > { %v435_v13 = vmul.f32 0.2, %v388_v10  ;;  %v457_v39 = vmax.f32 %v395_v29, %v441_v34 }
  0xab   : > { %v436_v16 = vmul.f32 0.2, %v417_v11  ;;  %v442_v37 = vmul.f32 0.2, %v424_v31 }
  0xac   : > { %v451_v21 = vmax.f32 %v388_v10, %v435_v13  ;;  %v467_v42 = vpack.c.bf16 %v457_v39, %v455_v38 }
  0xad   : > { %v452_v24 = vmax.f32 %v417_v11, %v436_v16  ;;  %v397_v32 = vpop.f32.mrf.mxu2  ;;  %v458_v41 = vmax.f32 %v424_v31, %v442_v37  ;;  %v1564_v16 = vperm.slane %v817_v7, 0 }
  0xae   : > { %v398_v46 = vadd.f32 %v397_v32, %v1529_v51 }
  0xaf   : > { %v389_v12 = vpop.f32.mrf.mxu0  ;;  %v468_v44 = vpack.c.bf16 %v458_v41, %v456_v40 }
  0xb0   : > { %v390_v14 = vadd.f32 %v389_v12, %v1529_v51  ;;  %v418_v15 = vpop.f32.mrf.mxu1  ;;  %v426_v35 = vpop.f32.mrf.mxu3  ;;  %v443_v50 = vmul.f32 0.2, %v398_v46  ;;  %v1562_v12 = vperm.slane %v817_v7, 1 }
  0xb1   : > { %v419_v17 = vadd.f32 %v418_v15, %v1531_v53  ;;  %v427_v48 = vadd.f32 %v426_v35, %v1531_v53 }
  0xb2   : > { %v437_v18 = vmul.f32 0.2, %v390_v14  ;;  %v459_v56 = vmax.f32 %v398_v46, %v443_v50 }
  0xb3   : > { %v438_v19 = vmul.f32 0.2, %v419_v17  ;;  %v444_v54 = vmul.f32 0.2, %v427_v48 }
  0xb4   : > { %v453_v22 = vmax.f32 %v390_v14, %v437_v18 }
  0xb5   : > { %v454_v25 = vmax.f32 %v419_v17, %v438_v19  ;;  %v399_v43 = vpop.f32.mrf.mxu2  ;;  %v460_v58 = vmax.f32 %v427_v48, %v444_v54 }
  0xb6   : > { %v465_v26 = vpack.c.bf16 %v453_v22, %v451_v21  ;;  %v400_v47 = vadd.f32 %v399_v43, %v1529_v51  ;;  %v503_v51 = vld [vmem:[%s1634_s4] sm:$0x3] }
  0xb7   : > { %v466_v27 = vpack.c.bf16 %v454_v25, %v452_v24  ;;  %v1552_v62 = vperm.slane %v503_v51, 1  ;;  %v1555_v2 = vperm.slane %v503_v51, 0 }
  0xb8   : > { %682 = vmatmul.bf16.gmra.mxu2 %v465_v26  ;;  %740 = vmatmul.bf16.gmra.mxu0 %v465_v26  ;;  %v428_v45 = vpop.f32.mrf.mxu3  ;;  %v445_v52 = vmul.f32 0.2, %v400_v47 }
  0xb9   : > { %711 = vmatmul.bf16.gmra.mxu3 %v466_v27  ;;  %769 = vmatmul.bf16.gmra.mxu1 %v466_v27  ;;  %v429_v49 = vadd.f32 %v428_v45, %v1531_v53 }
  0xba   : > { %v461_v57 = vmax.f32 %v400_v47, %v445_v52 }
  0xbb   : > { %v446_v55 = vmul.f32 0.2, %v429_v49 }
  0xbc   : > { %v469_v60 = vpack.c.bf16 %v461_v57, %v459_v56 }
  0xbd   : > { %v462_v59 = vmax.f32 %v429_v49, %v446_v55 }
  0xbf   : > { %v470_v61 = vpack.c.bf16 %v462_v59, %v460_v58 }
  0xc8   : > { %687 = vmatmul.bf16.gmra.mxu2 %v467_v42  ;;  %745 = vmatmul.bf16.gmra.mxu0 %v467_v42 }
  0xc9   : > { %716 = vmatmul.bf16.gmra.mxu3 %v468_v44  ;;  %774 = vmatmul.bf16.gmra.mxu1 %v468_v44 }
  0xd8   : > { %692 = vmatmul.bf16.gmra.mxu2 %v469_v60  ;;  %750 = vmatmul.bf16.gmra.mxu0 %v469_v60 }
  0xd9   : > { %721 = vmatmul.bf16.gmra.mxu3 %v470_v61  ;;  %779 = vmatmul.bf16.gmra.mxu1 %v470_v61 }
 0x125   : > { %v736_v53 = vpop.f32.mrf.mxu0 }
 0x126   : > { %v737_v63 = vadd.f32 %v736_v53, %v1552_v62  ;;  %v765_v0 = vpop.f32.mrf.mxu1 }
 0x128   : > { %v766_v1 = vadd.f32 %v765_v0, %v737_v63 }
 0x12a   : > { %v786_v4 = vmul.f32 0.2, %v766_v1 }
 0x12b   : > { %v678_v3 = vpop.f32.mrf.mxu2 }
 0x12c   : > { %v679_v5 = vadd.f32 %v678_v3, %v1555_v2  ;;  %v707_v6 = vpop.f32.mrf.mxu3  ;;  %v802_v13 = vmax.f32 %v766_v1, %v786_v4 }
 0x12d   : > { %v738_v8 = vpop.f32.mrf.mxu0 }
 0x12e   : > { %v708_v9 = vadd.f32 %v707_v6, %v679_v5  ;;  %v739_v10 = vadd.f32 %v738_v8, %v1552_v62  ;;  %v767_v11 = vpop.f32.mrf.mxu1  ;;  %v824_v23 = vmul.f32 %v1562_v12, %v802_v13 }
 0x130   : > { %v785_v14 = vmul.f32 0.2, %v708_v9  ;;  %v768_v15 = vadd.f32 %v767_v11, %v739_v10 }
 0x132   : > { %v801_v17 = vmax.f32 %v708_v9, %v785_v14  ;;  %v788_v19 = vmul.f32 0.2, %v768_v15 }
 0x133   : > { %v680_v18 = vpop.f32.mrf.mxu2 }
 0x134   : > { %v681_v20 = vadd.f32 %v680_v18, %v1555_v2  ;;  %v709_v21 = vpop.f32.mrf.mxu3  ;;  %v823_v22 = vmul.f32 %v1564_v16, %v801_v17  ;;  %v804_v29 = vmax.f32 %v768_v15, %v788_v19 }
 0x135   : > { %v741_v24 = vpop.f32.mrf.mxu0 }
 0x136   : > { %v710_v25 = vadd.f32 %v709_v21, %v681_v20  ;;  %v742_v26 = vadd.f32 %v741_v24, %v1552_v62  ;;  %v770_v27 = vpop.f32.mrf.mxu1  ;;  %v839_v28 = vadd.f32 %v824_v23, %v823_v22  ;;  %v826_v38 = vmul.f32 %v1562_v12, %v804_v29 }
 0x138   : > { %v787_v30 = vmul.f32 0.2, %v710_v25  ;;  %v771_v31 = vadd.f32 %v770_v27, %v742_v26  ;;  %840 = vadd.xlane.f32.xlu0 %v839_v28 }
 0x13a   : > { %v803_v32 = vmax.f32 %v710_v25, %v787_v30  ;;  %v790_v34 = vmul.f32 0.2, %v771_v31 }
 0x13b   : > { %v683_v33 = vpop.f32.mrf.mxu2 }
 0x13c   : > { %v684_v35 = vadd.f32 %v683_v33, %v1555_v2  ;;  %v712_v36 = vpop.f32.mrf.mxu3  ;;  %v825_v37 = vmul.f32 %v1564_v16, %v803_v32  ;;  %v806_v44 = vmax.f32 %v771_v31, %v790_v34 }
 0x13d   : > { %v743_v39 = vpop.f32.mrf.mxu0 }
 0x13e   : > { %v713_v40 = vadd.f32 %v712_v36, %v684_v35  ;;  %v744_v41 = vadd.f32 %v743_v39, %v1552_v62  ;;  %v772_v42 = vpop.f32.mrf.mxu1  ;;  %v842_v43 = vadd.f32 %v826_v38, %v825_v37  ;;  %v828_v55 = vmul.f32 %v1562_v12, %v806_v44 }
 0x140   : > { %v789_v45 = vmul.f32 0.2, %v713_v40  ;;  %v773_v46 = vadd.f32 %v772_v42, %v744_v41  ;;  %843 = vadd.xlane.f32.xlu0 %v842_v43 }
 0x142   : > { %v805_v47 = vmax.f32 %v713_v40, %v789_v45  ;;  %v792_v49 = vmul.f32 0.2, %v773_v46 }
 0x143   : > { %v685_v48 = vpop.f32.mrf.mxu2 }
 0x144   : > { %v686_v50 = vadd.f32 %v685_v48, %v1555_v2  ;;  %v714_v52 = vpop.f32.mrf.mxu3  ;;  %v827_v54 = vmul.f32 %v1564_v16, %v805_v47  ;;  %v808_v61 = vmax.f32 %v773_v46, %v792_v49 }
 0x145   : > { %v746_v56 = vpop.f32.mrf.mxu0 }
 0x146   : > { %v715_v57 = vadd.f32 %v714_v52, %v686_v50  ;;  %v747_v58 = vadd.f32 %v746_v56, %v1552_v62  ;;  %v775_v59 = vpop.f32.mrf.mxu1  ;;  %v845_v60 = vadd.f32 %v828_v55, %v827_v54  ;;  %v830_v6 = vmul.f32 %v1562_v12, %v808_v61 }
 0x148   : > { %v791_v51 = vmul.f32 0.2, %v715_v57  ;;  %v776_v53 = vadd.f32 %v775_v59, %v747_v58  ;;  %846 = vadd.xlane.f32.xlu1 %v845_v60 }
 0x14a   : > { %v807_v63 = vmax.f32 %v715_v57, %v791_v51  ;;  %v794_v1 = vmul.f32 0.2, %v776_v53 }
 0x14b   : > { %v688_v0 = vpop.f32.mrf.mxu2 }
 0x14c   : > { %v689_v3 = vadd.f32 %v688_v0, %v1555_v2  ;;  %v717_v4 = vpop.f32.mrf.mxu3  ;;  %v829_v5 = vmul.f32 %v1564_v16, %v807_v63  ;;  %v810_v13 = vmax.f32 %v776_v53, %v794_v1  ;;  %v1595_v53 = vld [vmem:[#allocation2] ss:$0 sm:$0xff] }
 0x14d   : > { %v748_v7 = vpop.f32.mrf.mxu0 }
 0x14e   : > { %v718_v8 = vadd.f32 %v717_v4, %v689_v3  ;;  %v749_v9 = vadd.f32 %v748_v7, %v1552_v62  ;;  %v777_v10 = vpop.f32.mrf.mxu1  ;;  %v848_v11 = vadd.f32 %v830_v6, %v829_v5  ;;  %v832_v23 = vmul.f32 %v1562_v12, %v810_v13 }
 0x150   : > { %v793_v14 = vmul.f32 0.2, %v718_v8  ;;  %v778_v15 = vadd.f32 %v777_v10, %v749_v9  ;;  %849 = vadd.xlane.f32.xlu1 %v848_v11 }
 0x152   : > { %v809_v17 = vmax.f32 %v718_v8, %v793_v14  ;;  %v796_v19 = vmul.f32 0.2, %v778_v15 }
 0x153   : > { %v690_v18 = vpop.f32.mrf.mxu2 }
 0x154   : > { %v691_v20 = vadd.f32 %v690_v18, %v1555_v2  ;;  %v719_v21 = vpop.f32.mrf.mxu3  ;;  %v831_v22 = vmul.f32 %v1564_v16, %v809_v17  ;;  %v812_v29 = vmax.f32 %v778_v15, %v796_v19 }
 0x155   : > { %v751_v24 = vpop.f32.mrf.mxu0 }
 0x156   : > { %v720_v25 = vadd.f32 %v719_v21, %v691_v20  ;;  %v752_v26 = vadd.f32 %v751_v24, %v1552_v62  ;;  %v780_v27 = vpop.f32.mrf.mxu1  ;;  %v851_v28 = vadd.f32 %v832_v23, %v831_v22  ;;  %v834_v38 = vmul.f32 %v1562_v12, %v812_v29 }
 0x158   : > { %v795_v30 = vmul.f32 0.2, %v720_v25  ;;  %v781_v31 = vadd.f32 %v780_v27, %v752_v26  ;;  %852 = vadd.xlane.f32.xlu2 %v851_v28 }
 0x15a   : > { %v811_v32 = vmax.f32 %v720_v25, %v795_v30  ;;  %v798_v34 = vmul.f32 0.2, %v781_v31 }
 0x15b   : > { %v693_v33 = vpop.f32.mrf.mxu2 }
 0x15c   : > { %v694_v35 = vadd.f32 %v693_v33, %v1555_v2  ;;  %v722_v36 = vpop.f32.mrf.mxu3  ;;  %v833_v37 = vmul.f32 %v1564_v16, %v811_v32  ;;  %v814_v44 = vmax.f32 %v781_v31, %v798_v34 }
 0x15d   : > { %v753_v39 = vpop.f32.mrf.mxu0 }
 0x15e   : > { %v723_v40 = vadd.f32 %v722_v36, %v694_v35  ;;  %v754_v41 = vadd.f32 %v753_v39, %v1552_v62  ;;  %v854_v42 = vadd.f32 %v834_v38, %v833_v37  ;;  %v782_v43 = vpop.f32.mrf.mxu1  ;;  %v836_v54 = vmul.f32 %v1562_v12, %v814_v44 }
 0x160   : > { %v797_v45 = vmul.f32 0.2, %v723_v40  ;;  %v783_v46 = vadd.f32 %v782_v43, %v754_v41  ;;  %855 = vadd.xlane.f32.xlu2 %v854_v42 }
 0x162   : > { %v813_v47 = vmax.f32 %v723_v40, %v797_v45  ;;  %v800_v49 = vmul.f32 0.2, %v783_v46 }
 0x163   : > { %v695_v48 = vpop.f32.mrf.mxu2 }
 0x164   : > { %v696_v50 = vadd.f32 %v695_v48, %v1555_v2  ;;  %v835_v52 = vmul.f32 %v1564_v16, %v813_v47  ;;  %v724_v55 = vpop.f32.mrf.mxu3  ;;  %v816_v58 = vmax.f32 %v783_v46, %v800_v49 }
 0x166   : > { %v725_v56 = vadd.f32 %v724_v55, %v696_v50  ;;  %v857_v57 = vadd.f32 %v836_v54, %v835_v52  ;;  %v838_v61 = vmul.f32 %v1562_v12, %v816_v58 }
 0x168   : > { %v799_v62 = vmul.f32 0.2, %v725_v56  ;;  %858 = vadd.xlane.f32.xlu0 %v857_v57 }
 0x16a   : > { %v815_v59 = vmax.f32 %v725_v56, %v799_v62 }
 0x16c   : > { %v837_v60 = vmul.f32 %v1564_v16, %v815_v59 }
 0x16e   : > { %v860_v51 = vadd.f32 %v838_v61, %v837_v60 }
 0x170   : > { %861 = vadd.xlane.f32.xlu1 %v860_v51 }
 0x1ab   : > { %v841_v2 = vpop.xlane.xlu0 %840 }
 0x1ac   : > { %v867_v63 = vadd.f32 %v1595_v53, %v841_v2 }
 0x1ae   : > { %v875_v0 = vsub.f32 0.0, %v867_v63 }
 0x1b0   : > { %v883_v1 = vmul.f32 1.442695, %v875_v0 }
 0x1b2   : > { %1351 = vpow2.f32 %v883_v1 }
 0x1b3   : > { %v844_v3 = vpop.xlane.xlu0 %843 }
 0x1b4   : > { %v868_v4 = vadd.f32 %v1595_v53, %v844_v3 }
 0x1b6   : > { %v876_v5 = vsub.f32 0.0, %v868_v4 }
 0x1b8   : > { %v1352_v6 = vpop.eup %1351  ;;  %v885_v7 = vmul.f32 1.442695, %v876_v5 }
 0x1b9   : > { %v899_v8 = vadd.f32 1.0, %v1352_v6 }
 0x1ba   : > { %1353 = vpow2.f32 %v885_v7 }
 0x1bb   : > { %1355 = vrcp.f32 %v899_v8  ;;  %v847_v12 = vpop.xlane.xlu1 %846  ;;  %v918_v20 = vand.u32 2147483648, %v899_v8  ;;  %v916_v22 = vand.u32 2147483647, %v899_v8  ;;  %vm912_vm2 = vweird.f32 %v899_v8 }
 0x1bc   : > { %v869_v16 = vadd.f32 %v1595_v53, %v847_v12 }
 0x1bd   : > { %v919_v28 = vor.u32 1.1754944e-38, %v918_v20  ;;  %vm917_vm5 = vcmp.eq.f32.partialorder %v916_v22, 8.507059e+37 }
 0x1be   : > { %v877_v9 = vsub.f32 0.0, %v869_v16 }
 0x1c0   : > { %v1354_v10 = vpop.eup %1353  ;;  %v887_v11 = vmul.f32 1.442695, %v877_v9 }
 0x1c1   : > { %v1356_v13 = vpop.eup %1355  ;;  %v900_v14 = vadd.f32 1.0, %v1354_v10 }
 0x1c2   : > { %v908_v15 = vmul.f32 %v1356_v13, %v899_v8  ;;  %1357 = vpow2.f32 %v887_v11  ;;  %vm913_vm1 = vweird.f32 %v1356_v13 }
 0x1c3   : > { %1359 = vrcp.f32 %v900_v14  ;;  %v850_v17 = vpop.xlane.xlu1 %849  ;;  %vm914_vm4 = vmor %vm912_vm2, %vm913_vm1  ;;  %v933_v36 = vand.u32 2147483648, %v900_v14  ;;  %v931_v38 = vand.u32 2147483647, %v900_v14  ;;  %vm927_vm7 = vweird.f32 %v900_v14 }
 0x1c4   : > { %v909_v18 = vsub.f32 1.0, %v908_v15  ;;  %v870_v19 = vadd.f32 %v1595_v53, %v850_v17 }
 0x1c5   : > { %v934_v44 = vor.u32 1.1754944e-38, %v933_v36  ;;  %vm932_vm9 = vcmp.eq.f32.partialorder %v931_v38, 8.507059e+37 }
 0x1c6   : > { %v910_v21 = vmul.f32 %v1356_v13, %v909_v18  ;;  %v878_v23 = vsub.f32 0.0, %v870_v19 }
 0x1c8   : > { %v1358_v24 = vpop.eup %1357  ;;  %v911_v25 = vadd.f32 %v1356_v13, %v910_v21  ;;  %v889_v26 = vmul.f32 1.442695, %v878_v23 }
 0x1c9   : > { %v1360_v27 = vpop.eup %1359  ;;  %v901_v29 = vadd.f32 1.0, %v1358_v24 }
 0x1ca   : > { %v915_v30 = vsel %vm914_vm4, %v1356_v13, %v911_v25  ;;  %v923_v31 = vmul.f32 %v1360_v27, %v900_v14  ;;  %1361 = vpow2.f32 %v889_v26  ;;  %vm928_vm6 = vweird.f32 %v1360_v27 }
 0x1cb   : > { %v920_v32 = vsel %vm917_vm5, %v919_v28, %v915_v30  ;;  %1363 = vrcp.f32 %v901_v29  ;;  %v853_v33 = vpop.xlane.xlu2 %852  ;;  %vm929_vm8 = vmor %vm927_vm7, %vm928_vm6  ;;  %v948_v54 = vand.u32 2147483648, %v901_v29  ;;  %v946_v56 = vand.u32 2147483647, %v901_v29 }
 0x1cc   : > { %1028 = vst.msk [vmem:[%s1605_s19] sm:$0xff] %vm1027_vm3, %v920_v32  ;;  %v924_v34 = vsub.f32 1.0, %v923_v31  ;;  %v871_v35 = vadd.f32 %v1595_v53, %v853_v33  ;;  %vm942_vm11 = vweird.f32 %v901_v29 }
 0x1cd   : > { %v949_v61 = vor.u32 1.1754944e-38, %v948_v54  ;;  %vm947_vm13 = vcmp.eq.f32.partialorder %v946_v56, 8.507059e+37 }
 0x1ce   : > { %v925_v37 = vmul.f32 %v1360_v27, %v924_v34  ;;  %v879_v39 = vsub.f32 0.0, %v871_v35 }
 0x1d0   : > { %v1362_v40 = vpop.eup %1361  ;;  %v926_v41 = vadd.f32 %v1360_v27, %v925_v37  ;;  %v891_v42 = vmul.f32 1.442695, %v879_v39 }
 0x1d1   : > { %v1364_v43 = vpop.eup %1363  ;;  %v902_v45 = vadd.f32 1.0, %v1362_v40 }
 0x1d2   : > { %v930_v46 = vsel %vm929_vm8, %v1360_v27, %v926_v41  ;;  %v938_v47 = vmul.f32 %v1364_v43, %v901_v29  ;;  %1365 = vpow2.f32 %v891_v42  ;;  %vm943_vm10 = vweird.f32 %v1364_v43 }
 0x1d3   : > { %v935_v48 = vsel %vm932_vm9, %v934_v44, %v930_v46  ;;  %1367 = vrcp.f32 %v902_v45  ;;  %v856_v49 = vpop.xlane.xlu2 %855  ;;  %vm944_vm12 = vmor %vm942_vm11, %vm943_vm10  ;;  %v963_v5 = vand.u32 2147483648, %v902_v45  ;;  %v961_v7 = vand.u32 2147483647, %v902_v45 }
 0x1d4   : > { %1029 = vst.msk [vmem:[%s1605_s19 + $0x8] sm:$0xff] %vm1027_vm3, %v935_v48  ;;  %v939_v50 = vsub.f32 1.0, %v938_v47  ;;  %v872_v52 = vadd.f32 %v1595_v53, %v856_v49  ;;  %vm957_vm15 = vweird.f32 %v902_v45 }
 0x1d5   : > { %v964_v11 = vor.u32 1.1754944e-38, %v963_v5  ;;  %vm962_vm1 = vcmp.eq.f32.partialorder %v961_v7, 8.507059e+37 }
 0x1d6   : > { %v940_v55 = vmul.f32 %v1364_v43, %v939_v50  ;;  %v880_v57 = vsub.f32 0.0, %v872_v52 }
 0x1d8   : > { %v1366_v58 = vpop.eup %1365  ;;  %v941_v62 = vadd.f32 %v1364_v43, %v940_v55  ;;  %v893_v59 = vmul.f32 1.442695, %v880_v57 }
 0x1d9   : > { %v1368_v60 = vpop.eup %1367  ;;  %v903_v51 = vadd.f32 1.0, %v1366_v58 }
 0x1da   : > { %v945_v2 = vsel %vm944_vm12, %v1364_v43, %v941_v62  ;;  %v953_v63 = vmul.f32 %v1368_v60, %v902_v45  ;;  %1369 = vpow2.f32 %v893_v59  ;;  %vm958_vm14 = vweird.f32 %v1368_v60 }
 0x1db   : > { %v950_v0 = vsel %vm947_vm13, %v949_v61, %v945_v2  ;;  %1371 = vrcp.f32 %v903_v51  ;;  %v859_v1 = vpop.xlane.xlu0 %858  ;;  %vm959_vm0 = vmor %vm957_vm15, %vm958_vm14  ;;  %v978_v21 = vand.u32 2147483648, %v903_v51  ;;  %v976_v23 = vand.u32 2147483647, %v903_v51 }
 0x1dc   : > { %1030 = vst.msk [vmem:[%s1605_s19 + $0x10] sm:$0xff] %vm1027_vm3, %v950_v0  ;;  %v954_v3 = vsub.f32 1.0, %v953_v63  ;;  %v873_v4 = vadd.f32 %v1595_v53, %v859_v1  ;;  %vm972_vm4 = vweird.f32 %v903_v51 }
 0x1dd   : > { %v979_v29 = vor.u32 1.1754944e-38, %v978_v21  ;;  %vm977_vm6 = vcmp.eq.f32.partialorder %v976_v23, 8.507059e+37 }
 0x1de   : > { %v955_v6 = vmul.f32 %v1368_v60, %v954_v3  ;;  %v881_v8 = vsub.f32 0.0, %v873_v4 }
 0x1e0   : > { %v1370_v12 = vpop.eup %1369  ;;  %v956_v16 = vadd.f32 %v1368_v60, %v955_v6  ;;  %v895_v9 = vmul.f32 1.442695, %v881_v8 }
 0x1e1   : > { %v1372_v10 = vpop.eup %1371  ;;  %v904_v13 = vadd.f32 1.0, %v1370_v12 }
 0x1e2   : > { %v960_v14 = vsel %vm959_vm0, %v1368_v60, %v956_v16  ;;  %v968_v15 = vmul.f32 %v1372_v10, %v903_v51  ;;  %1373 = vpow2.f32 %v895_v9  ;;  %vm973_vm2 = vweird.f32 %v1372_v10 }
 0x1e3   : > { %v965_v17 = vsel %vm962_vm1, %v964_v11, %v960_v14  ;;  %1375 = vrcp.f32 %v904_v13  ;;  %v862_v18 = vpop.xlane.xlu1 %861  ;;  %vm974_vm5 = vmor %vm972_vm4, %vm973_vm2  ;;  %v993_v34 = vand.u32 2147483648, %v904_v13  ;;  %v991_v36 = vand.u32 2147483647, %v904_v13 }
 0x1e4   : > { %1031 = vst.msk [vmem:[%s1605_s19 + $0x18] sm:$0xff] %vm1027_vm3, %v965_v17  ;;  %v969_v19 = vsub.f32 1.0, %v968_v15  ;;  %v874_v20 = vadd.f32 %v1595_v53, %v862_v18  ;;  %vm987_vm8 = vweird.f32 %v904_v13 }
 0x1e5   : > { %v994_v40 = vor.u32 1.1754944e-38, %v993_v34  ;;  %vm992_vm10 = vcmp.eq.f32.partialorder %v991_v36, 8.507059e+37 }
 0x1e6   : > { %v970_v22 = vmul.f32 %v1372_v10, %v969_v19  ;;  %v882_v24 = vsub.f32 0.0, %v874_v20 }
 0x1e8   : > { %v1374_v25 = vpop.eup %1373  ;;  %v971_v26 = vadd.f32 %v1372_v10, %v970_v22  ;;  %v897_v27 = vmul.f32 1.442695, %v882_v24 }
 0x1e9   : > { %v1376_v28 = vpop.eup %1375  ;;  %v905_v30 = vadd.f32 1.0, %v1374_v25 }
 0x1ea   : > { %v975_v31 = vsel %vm974_vm5, %v1372_v10, %v971_v26  ;;  %v983_v32 = vmul.f32 %v1376_v28, %v904_v13  ;;  %1377 = vpow2.f32 %v897_v27  ;;  %vm988_vm7 = vweird.f32 %v1376_v28 }
 0x1eb   : > { %v980_v33 = vsel %vm977_vm6, %v979_v29, %v975_v31  ;;  %1379 = vrcp.f32 %v905_v30  ;;  %vm989_vm9 = vmor %vm987_vm8, %vm988_vm7  ;;  %v1008_v46 = vand.u32 2147483648, %v905_v30  ;;  %v1006_v48 = vand.u32 2147483647, %v905_v30 }
 0x1ec   : > { %1032 = vst.msk [vmem:[%s1605_s19 + $0x20] sm:$0xff] %vm1027_vm3, %v980_v33  ;;  %v984_v53 = vsub.f32 1.0, %v983_v32  ;;  %vm1002_vm12 = vweird.f32 %v905_v30 }
 0x1ed   : > { %v1009_v52 = vor.u32 1.1754944e-38, %v1008_v46  ;;  %vm1007_vm14 = vcmp.eq.f32.partialorder %v1006_v48, 8.507059e+37 }
 0x1ee   : > { %v985_v35 = vmul.f32 %v1376_v28, %v984_v53 }
 0x1f0   : > { %v1378_v37 = vpop.eup %1377  ;;  %v986_v38 = vadd.f32 %v1376_v28, %v985_v35 }
 0x1f1   : > { %v1380_v39 = vpop.eup %1379  ;;  %v906_v41 = vadd.f32 1.0, %v1378_v37 }
 0x1f2   : > { %v990_v42 = vsel %vm989_vm9, %v1376_v28, %v986_v38  ;;  %v998_v43 = vmul.f32 %v1380_v39, %v905_v30  ;;  %vm1003_vm11 = vweird.f32 %v1380_v39 }
 0x1f3   : > { %v995_v44 = vsel %vm992_vm10, %v994_v40, %v990_v42  ;;  %1381 = vrcp.f32 %v906_v41  ;;  %vm1004_vm13 = vmor %vm1002_vm12, %vm1003_vm11  ;;  %v1023_v58 = vand.u32 2147483648, %v906_v41  ;;  %v1021_v59 = vand.u32 2147483647, %v906_v41 }
 0x1f4   : > { %1033 = vst.msk [vmem:[%s1605_s19 + $0x28] sm:$0xff] %vm1027_vm3, %v995_v44  ;;  %v999_v45 = vsub.f32 1.0, %v998_v43  ;;  %vm1017_vm0 = vweird.f32 %v906_v41 }
 0x1f5   : > { %v1024_v61 = vor.u32 1.1754944e-38, %v1023_v58  ;;  %vm1022_vm2 = vcmp.eq.f32.partialorder %v1021_v59, 8.507059e+37 }
 0x1f6   : > { %v1000_v47 = vmul.f32 %v1380_v39, %v999_v45 }
 0x1f8   : > { %v1001_v49 = vadd.f32 %v1380_v39, %v1000_v47 }
 0x1f9   : > { %v1382_v50 = vpop.eup %1381 }
 0x1fa   : > { %v1005_v54 = vsel %vm1004_vm13, %v1380_v39, %v1001_v49  ;;  %v1013_v55 = vmul.f32 %v1382_v50, %v906_v41  ;;  %vm1018_vm15 = vweird.f32 %v1382_v50 }
 0x1fb   : > { %v1010_v56 = vsel %vm1007_vm14, %v1009_v52, %v1005_v54  ;;  %vm1019_vm1 = vmor %vm1017_vm0, %vm1018_vm15 }
 0x1fc   : > { %1034 = vst.msk [vmem:[%s1605_s19 + $0x30] sm:$0xff] %vm1027_vm3, %v1010_v56  ;;  %v1014_v57 = vsub.f32 1.0, %v1013_v55 }
 0x1fe   : > { %v1015_v62 = vmul.f32 %v1382_v50, %v1014_v57 }
 0x200   : > { %v1016_v60 = vadd.f32 %v1382_v50, %v1015_v62 }
 0x202   : > { %v1020_v51 = vsel %vm1019_vm1, %v1382_v50, %v1016_v60 }
 0x203   : > { %v1025_v2 = vsel %vm1022_vm2, %v1024_v61, %v1020_v51 }
 0x204   : > { %1035 = vst.msk [vmem:[%s1605_s19 + $0x38] sm:$0xff] %vm1027_vm3, %v1025_v2 }
 0x205 PF: > { %s20_s26 = sadd.s32 1, %s1423_s26  }
 0x206   : > { %p17_p7 = scmp.ge.s32.totalorder %s20_s26, 4  }
 0x208   :  { %19 = sbr.rel (!%p17_p7) target bundleno = 4 (0x4), region = 83 }
 0x20d   :  { %1058 = vsyncpa [#allocation4], 1 }
 0x20e   :  { %1060 = vsyncpa [#allocation4 + $0x1], 1 }

</bundles_post_ra>
